<compile_context>
chip_gen: v6e
topology: v6e:2x2x1
jax: 0.10.0
libtpu: 0.0.40
codegen_flags: <defaults>
</compile_context>

<pallas_src>
import numpy as np

import jax
import jax.numpy as jnp
from jax.experimental import pallas as pl
from jax.experimental.pallas import tpu as pltpu

EPS = 1e-5
EXPANSION = 4
LANE = 128
VMEM_LIMIT = 32 * 1024 * 1024  # > v5e's 16 MiB default, safe on v7x (64 MiB phys)


def _round_up(x, m):
    return (x + m - 1) // m * m


# ---------------------------------------------------------------------------
# Pallas kernels (tiled over the point dimension; point axis is "parallel")
# ---------------------------------------------------------------------------
def _stats_rows(h):
    """Tile-partial [2, C] (sum, sum-of-squares) of a [TN, C] f32 block."""
    s = jnp.sum(h, axis=0, keepdims=True)
    sq = jnp.sum(h * h, axis=0, keepdims=True)
    return jnp.concatenate([s, sq], axis=0)


def _make_stage1_kernel(use_downsample, cmid_p):
    """conv1 (1x1x1) (+ downsample conv, via one fused weight) + partial stats."""
    if use_downsample:
        def kernel(x_ref, w_ref, h1_ref, rd_ref, s1_ref, sd_ref):
            xb = x_ref[...].astype(jnp.bfloat16)
            h = jnp.dot(xb, w_ref[...], preferred_element_type=jnp.float32)
            h1 = h[:, :cmid_p]
            rd = h[:, cmid_p:]
            h1_ref[...] = h1.astype(jnp.bfloat16)
            rd_ref[...] = rd.astype(jnp.bfloat16)
            s1_ref[0] = _stats_rows(h1)
            sd_ref[0] = _stats_rows(rd)
    else:
        def kernel(x_ref, w_ref, h1_ref, s1_ref):
            xb = x_ref[...].astype(jnp.bfloat16)
            h1 = jnp.dot(xb, w_ref[...], preferred_element_type=jnp.float32)
            h1_ref[...] = h1.astype(jnp.bfloat16)
            s1_ref[0] = _stats_rows(h1)
    return kernel


def _stage2_kernel(g_ref, w2_ref, c2_ref, s2_ref, acc_ref):
    """conv2 as a K-accumulation over the [K, N, Cmid] bf16 gathered tensor."""
    k = pl.program_id(1)

    @pl.when(k == 0)
    def _():
        acc_ref[...] = jnp.zeros_like(acc_ref)

    acc_ref[...] += jnp.dot(g_ref[0], w2_ref[0], preferred_element_type=jnp.float32)

    @pl.when(k == pl.num_programs(1) - 1)
    def _():
        c2 = acc_ref[...]
        c2_ref[...] = c2.astype(c2_ref.dtype)
        s2_ref[0] = _stats_rows(c2)


def _make_stage3_kernel(n_valid, tn):
    """BN2 affine apply + conv3 (1x1x1) + partial stats (padded rows masked)."""
    def kernel(c2_ref, sc_ref, sh_ref, w3_ref, h3_ref, s3_ref):
        h2 = c2_ref[...].astype(jnp.float32) * sc_ref[...] + sh_ref[...]
        row = pl.program_id(0) * tn + jax.lax.broadcasted_iota(jnp.int32, (tn, 1), 0)
        h2 = jnp.where(row < n_valid, h2, 0.0)  # keep padded rows out of BN3 stats
        h3 = jnp.dot(h2.astype(jnp.bfloat16), w3_ref[...],
                     preferred_element_type=jnp.float32)
        h3_ref[...] = h3.astype(jnp.bfloat16)
        s3_ref[0] = _stats_rows(h3)
    return kernel


def _make_stage4_kernel(use_downsample):
    """BN3 affine + residual branch (BNd affine or identity) + add + ReLU."""
    if use_downsample:
        def kernel(h3_ref, sc3_ref, sh3_ref, rd_ref, scd_ref, shd_ref, o_ref):
            h3n = h3_ref[...].astype(jnp.float32) * sc3_ref[...] + sh3_ref[...]
            rn = rd_ref[...].astype(jnp.float32) * scd_ref[...] + shd_ref[...]
            o_ref[...] = jnp.maximum(h3n + rn, 0.0)
    else:
        def kernel(h3_ref, sc3_ref, sh3_ref, x_ref, o_ref):
            h3n = h3_ref[...].astype(jnp.float32) * sc3_ref[...] + sh3_ref[...]
            o_ref[...] = jnp.maximum(h3n + x_ref[...], 0.0)
    return kernel


# ---------------------------------------------------------------------------
# BlockSpec helpers
# ---------------------------------------------------------------------------
def _row_spec(tn, c):
    return pl.BlockSpec((tn, c), lambda i: (i, 0))


def _full_spec(shape):
    nd = len(shape)
    return pl.BlockSpec(shape, lambda i, _nd=nd: (0,) * _nd)


def _stats_spec(c):
    return pl.BlockSpec((1, 2, c), lambda i: (i, 0, 0))


# ---------------------------------------------------------------------------
# Glue: neighbor indices + BN affine parameters
# ---------------------------------------------------------------------------
def build_neighbor_indices(coords, ks: int, dilation: int):
    """coords: [N,3] unique int voxel coords -> idx [ks^3, N] int32, -1 = missing.
    Sort + binary-search coordinate lookup, O(K * N * log N)."""
    n = coords.shape[0]
    r = ks // 2
    offs = []
    for dz in range(-r, r + 1):
        for dy in range(-r, r + 1):
            for dx in range(-r, r + 1):
                offs.append((dx, dy, dz))
    offs = jnp.asarray(offs, jnp.int32) * dilation                 # [K, 3]

    c = coords.astype(jnp.int32)
    base = jnp.min(c, axis=0) - r * dilation
    sc = c - base                                                  # >= 0
    dims = jnp.max(sc, axis=0) + 1 + r * dilation                  # neighbors < dims

    def encode(p):
        return (p[..., 0] * dims[1] + p[..., 1]) * dims[2] + p[..., 2]

    keys = encode(sc)                                              # [N], unique
    order = jnp.argsort(keys).astype(jnp.int32)
    skeys = keys[order]
    tgt = sc[None, :, :] + offs[:, None, :]                        # [K, N, 3]
    tkeys = encode(tgt)                                            # [K, N]
    pos = jnp.clip(jnp.searchsorted(skeys, tkeys), 0, n - 1)
    found = skeys[pos] == tkeys
    return jnp.where(found, order[pos], -1)                        # [K, N]


def _bn_affine(stats_partial, n, gamma_p, beta_p):
    """Partial [n_tiles,2,C] stats -> per-channel scale/shift (train-mode BN)."""
    s = jnp.sum(stats_partial, axis=0)                             # [2, C]
    mean = s[0] / n
    var = jnp.maximum(s[1] / n - mean * mean, 0.0)                 # biased variance
    scale = gamma_p * jax.lax.rsqrt(var + EPS)
    shift = beta_p - mean * scale
    return scale[None, :], shift[None, :]                          # [1, C] each


# ---------------------------------------------------------------------------
# Wrapper
# ---------------------------------------------------------------------------
def bottleneck_forward(x, coords, params, *, ks=3, stride=1, dilation=1, tn=512):
    assert stride == 1, "only stride=1 (submanifold) supported"

    n, inc = x.shape
    outc = params["w1"].shape[1]
    cout = outc * EXPANSION
    use_ds = not (inc == cout and stride == 1)
    if not use_ds:
        assert inc == cout, "identity residual requires inc == outc * expansion"

    k_conv = ks ** 3
    f32, bf16 = jnp.float32, jnp.bfloat16

    # padded sizes: 128-lane channels; point tiles a multiple of 16 rows (bf16
    # sublane packing).  Large tiles for HBM roofline, but keep n_tiles >= 2 so
    # the "parallel" axis can be split across v7x's two TensorCores.
    cin_p = _round_up(inc, LANE)
    cmid_p = _round_up(outc, LANE)
    cout_p = _round_up(cout, LANE)
    n16 = _round_up(n, 16)
    tn = max(16, min(tn, n16))
    if n16 >= 32:
        tn = min(tn, _round_up(n16 // 2, 16))
    n_pad = _round_up(n, tn)
    n_tiles = n_pad // tn

    # ---- pad inputs & params (matmul weights pre-cast to bf16) --------------
    x_p = jnp.zeros((n_pad, cin_p), f32).at[:n, :inc].set(x.astype(f32))
    w1_p = jnp.zeros((cin_p, cmid_p), bf16).at[:inc, :outc].set(params["w1"].astype(bf16))
    w2_p = jnp.zeros((k_conv, cmid_p, cmid_p), bf16).at[:, :outc, :outc].set(
        params["w2"].astype(bf16))
    w3_p = jnp.zeros((cmid_p, cout_p), bf16).at[:outc, :cout].set(params["w3"].astype(bf16))

    def pad_vec(v, c_p):
        return jnp.zeros((c_p,), f32).at[: v.size].set(v.reshape(-1).astype(f32))

    g1_p, b1_p = pad_vec(params["g1"], cmid_p), pad_vec(params["b1"], cmid_p)
    g2_p, b2_p = pad_vec(params["g2"], cmid_p), pad_vec(params["b2"], cmid_p)
    g3_p, b3_p = pad_vec(params["g3"], cout_p), pad_vec(params["b3"], cout_p)

    cp1 = pltpu.CompilerParams(dimension_semantics=("parallel",),
                               vmem_limit_bytes=VMEM_LIMIT)
    cp2 = pltpu.CompilerParams(dimension_semantics=("parallel", "arbitrary"),
                               vmem_limit_bytes=VMEM_LIMIT)

    # -------------------- stage 1: conv1 (+ downsample conv) + stats ---------
    if use_ds:
        wd_p = jnp.zeros((cin_p, cout_p), bf16).at[:inc, :cout].set(params["wd"].astype(bf16))
        gd_p, bd_p = pad_vec(params["gd"], cout_p), pad_vec(params["bd"], cout_p)
        w_cat = jnp.concatenate([w1_p, wd_p], axis=1)              # [cin_p, cmid_p+cout_p]
        flops1 = 2 * n_pad * cin_p * (cmid_p + cout_p)
        bytes1 = (n_pad * cin_p * 4 + w_cat.size * 2
                  + n_pad * (cmid_p + cout_p) * 2
                  + n_tiles * 2 * (cmid_p + cout_p) * 4)
        h1_raw, rd_raw, stats1, statsd = pl.pallas_call(
            _make_stage1_kernel(True, cmid_p),
            grid=(n_tiles,),
            in_specs=[_row_spec(tn, cin_p), _full_spec((cin_p, cmid_p + cout_p))],
            out_specs=(_row_spec(tn, cmid_p), _row_spec(tn, cout_p),
                       _stats_spec(cmid_p), _stats_spec(cout_p)),
            out_shape=(jax.ShapeDtypeStruct((n_pad, cmid_p), bf16),
                       jax.ShapeDtypeStruct((n_pad, cout_p), bf16),
                       jax.ShapeDtypeStruct((n_tiles, 2, cmid_p), f32),
                       jax.ShapeDtypeStruct((n_tiles, 2, cout_p), f32)),
            compiler_params=cp1,
            cost_estimate=pl.CostEstimate(flops=flops1, transcendentals=0,
                                          bytes_accessed=bytes1),
        )(x_p, w_cat)
    else:
        flops1 = 2 * n_pad * cin_p * cmid_p
        bytes1 = (n_pad * cin_p * 4 + w1_p.size * 2
                  + n_pad * cmid_p * 2 + n_tiles * 2 * cmid_p * 4)
        h1_raw, stats1 = pl.pallas_call(
            _make_stage1_kernel(False, cmid_p),
            grid=(n_tiles,),
            in_specs=[_row_spec(tn, cin_p), _full_spec((cin_p, cmid_p))],
            out_specs=(_row_spec(tn, cmid_p), _stats_spec(cmid_p)),
            out_shape=(jax.ShapeDtypeStruct((n_pad, cmid_p), bf16),
                       jax.ShapeDtypeStruct((n_tiles, 2, cmid_p), f32)),
            compiler_params=cp1,
            cost_estimate=pl.CostEstimate(flops=flops1, transcendentals=0,
                                          bytes_accessed=bytes1),
        )(x_p, w1_p)

    # ---- BN1 affine + neighbor gather (XLA glue, kept in bf16) --------------
    idx = build_neighbor_indices(coords, ks, dilation)             # [K, n]
    idx_p = jnp.full((k_conv, n_pad), -1, jnp.int32).at[:, :n].set(idx)

    sc1, sh1 = _bn_affine(stats1, n, g1_p, b1_p)
    # BN1 affine is applied BEFORE the gather; missing neighbors / padded rows
    # must contribute exactly zero, so they gather the appended zero row.
    h1n = (h1_raw.astype(f32) * sc1 + sh1).astype(bf16)            # [n_pad, cmid_p]
    h1n_z = jnp.concatenate([h1n, jnp.zeros((1, cmid_p), bf16)], axis=0)
    safe_idx = jnp.where(idx_p >= 0, idx_p, n_pad)                 # [K, n_pad]
    gathered = h1n_z[safe_idx]                                     # [K, n_pad, cmid_p] bf16

    # -------------------- stage 2: conv2 as a K-accumulation + stats ---------
    flops2 = 2 * n_pad * k_conv * cmid_p * cmid_p
    bytes2 = (gathered.size * 2 + w2_p.size * 2
              + n_pad * cmid_p * 2 + n_tiles * 2 * cmid_p * 4)
    c2_raw, stats2 = pl.pallas_call(
        _stage2_kernel,
        grid=(n_tiles, k_conv),
        in_specs=[pl.BlockSpec((1, tn, cmid_p), lambda i, k: (k, i, 0)),
                  pl.BlockSpec((1, cmid_p, cmid_p), lambda i, k: (k, 0, 0))],
        out_specs=(pl.BlockSpec((tn, cmid_p), lambda i, k: (i, 0)),
                   pl.BlockSpec((1, 2, cmid_p), lambda i, k: (i, 0, 0))),
        out_shape=(jax.ShapeDtypeStruct((n_pad, cmid_p), bf16),
                   jax.ShapeDtypeStruct((n_tiles, 2, cmid_p), f32)),
        scratch_shapes=[pltpu.VMEM((tn, cmid_p), f32)],
        compiler_params=cp2,
        cost_estimate=pl.CostEstimate(flops=flops2, transcendentals=0,
                                      bytes_accessed=bytes2),
    )(gathered, w2_p)

    # -------------------- stage 3: BN2 apply + conv3 + stats -----------------
    sc2, sh2 = _bn_affine(stats2, n, g2_p, b2_p)
    flops3 = 2 * n_pad * cmid_p * cout_p
    bytes3 = (n_pad * cmid_p * 2 + 2 * cmid_p * 4 + cmid_p * cout_p * 2
              + n_pad * cout_p * 2 + n_tiles * 2 * cout_p * 4)
    h3_raw, stats3 = pl.pallas_call(
        _make_stage3_kernel(n, tn),
        grid=(n_tiles,),
        in_specs=[_row_spec(tn, cmid_p), _full_spec((1, cmid_p)),
                  _full_spec((1, cmid_p)), _full_spec((cmid_p, cout_p))],
        out_specs=(_row_spec(tn, cout_p), _stats_spec(cout_p)),
        out_shape=(jax.ShapeDtypeStruct((n_pad, cout_p), bf16),
                   jax.ShapeDtypeStruct((n_tiles, 2, cout_p), f32)),
        compiler_params=cp1,
        cost_estimate=pl.CostEstimate(flops=flops3, transcendentals=0,
                                      bytes_accessed=bytes3),
    )(c2_raw, sc2, sh2, w3_p)

    # -------------------- stage 4: BN3 + residual + ReLU ---------------------
    sc3, sh3 = _bn_affine(stats3, n, g3_p, b3_p)
    if use_ds:
        scd, shd = _bn_affine(statsd, n, gd_p, bd_p)
        in_ops4 = (h3_raw, sc3, sh3, rd_raw, scd, shd)
        in_specs4 = [_row_spec(tn, cout_p), _full_spec((1, cout_p)),
                     _full_spec((1, cout_p)), _row_spec(tn, cout_p),
                     _full_spec((1, cout_p)), _full_spec((1, cout_p))]
        res_bytes = n_pad * cout_p * 2 + 4 * cout_p * 4
    else:
        in_ops4 = (h3_raw, sc3, sh3, x_p)
        in_specs4 = [_row_spec(tn, cout_p), _full_spec((1, cout_p)),
                     _full_spec((1, cout_p)), _row_spec(tn, cin_p)]
        res_bytes = n_pad * cin_p * 4 + 2 * cout_p * 4
    flops4 = 6 * n_pad * cout_p
    bytes4 = n_pad * cout_p * 2 + res_bytes + n_pad * cout_p * 4
    out_p = pl.pallas_call(
        _make_stage4_kernel(use_ds),
        grid=(n_tiles,),
        in_specs=in_specs4,
        out_specs=_row_spec(tn, cout_p),
        out_shape=jax.ShapeDtypeStruct((n_pad, cout_p), f32),
        compiler_params=cp1,
        cost_estimate=pl.CostEstimate(flops=flops4, transcendentals=0,
                                      bytes_accessed=bytes4),
    )(*in_ops4)

    return out_p[:n, :cout]


# ---------------------------------------------------------------------------
# Plain-JAX reference (exact f32 math, same semantics)
# ---------------------------------------------------------------------------
def bottleneck_ref(x, coords, params, *, ks=3, dilation=1):
    idx = build_neighbor_indices(coords, ks, dilation)             # [K, N]
    n = x.shape[0]

    def bn(h, g, b):
        mean = jnp.mean(h, axis=0, keepdims=True)
        var = jnp.mean((h - mean) ** 2, axis=0, keepdims=True)
        return g * (h - mean) / jnp.sqrt(var + EPS) + b

    h1 = bn(x @ params["w1"], params["g1"], params["b1"])
    h1z = jnp.concatenate([h1, jnp.zeros((1, h1.shape[1]), h1.dtype)], axis=0)
    gathered = h1z[jnp.where(idx >= 0, idx, n)]                    # [K, N, Cmid]
    acc = jnp.einsum("knc,kcd->nd", gathered, params["w2"])
    h2 = bn(acc, params["g2"], params["b2"])
    h3 = bn(h2 @ params["w3"], params["g3"], params["b3"])
    cout = params["w3"].shape[1]
    if x.shape[1] == cout:
        res = x
    else:
        res = bn(x @ params["wd"], params["gd"], params["bd"])
    return jnp.maximum(h3 + res, 0.0)


# ---------------------------------------------------------------------------
# Deterministic parameter init (shapes from Bottleneck.__init__)
# ---------------------------------------------------------------------------
def init_params(key, inc, outc, ks):
    k_conv = ks ** 3
    cout = outc * EXPANSION
    k1, k2, k3, k4 = jax.random.split(key, 4)
    w = lambda k, s: 0.1 * jax.random.normal(k, s, jnp.float32)
    ones = lambda c: jnp.ones((1, c), jnp.float32)
    zeros = lambda c: jnp.zeros((1, c), jnp.float32)
    return dict(
        w1=w(k1, (inc, outc)),          g1=ones(outc),  b1=zeros(outc),
        w2=w(k2, (k_conv, outc, outc)), g2=ones(outc),  b2=zeros(outc),
        w3=w(k3, (outc, cout)),         g3=ones(cout),  b3=zeros(cout),
        wd=w(k4, (inc, cout)),          gd=ones(cout),  bd=zeros(cout),
    )


# ---------------------------------------------------------------------------
if __name__ == "__main__":
    GRID = 8
    KS, STRIDE, DIL = 3, 1, 1
    N = 64

    key = jax.random.PRNGKey(0)
    k_coord, k_feat, k_param, k_feat2, k_param2 = jax.random.split(key, 5)

    # unique random voxel coordinates in [0, GRID)^3
    perm = jax.random.permutation(k_coord, GRID ** 3)[:N]
    coords = jnp.stack([perm // (GRID * GRID),
                        (perm // GRID) % GRID,
                        perm % GRID], axis=-1).astype(jnp.int32)          # [N, 3]

    # case 1: inc != outc*expansion  ->  downsample branch (conv + BN)
    INC, OUTC = 16, 8
    x = jax.random.normal(k_feat, (N, INC), jnp.float32)
    params = init_params(k_param, INC, OUTC, KS)
    out = jax.block_until_ready(
        bottleneck_forward(x, coords, params, ks=KS, stride=STRIDE, dilation=DIL))
    ref = bottleneck_ref(x, coords, params, ks=KS, dilation=DIL)
    assert out.shape == (N, OUTC * EXPANSION)
    assert np.all(np.isfinite(np.asarray(out)))
    np.testing.assert_allclose(np.asarray(out), np.asarray(ref), rtol=5e-2, atol=5e-2)

    # case 2: inc == outc*expansion  ->  identity residual
    INC2, OUTC2 = 32, 8
    x2 = jax.random.normal(k_feat2, (N, INC2), jnp.float32)
    params2 = init_params(k_param2, INC2, OUTC2, KS)
    out2 = jax.block_until_ready(
        bottleneck_forward(x2, coords, params2, ks=KS, stride=STRIDE, dilation=DIL))
    ref2 = bottleneck_ref(x2, coords, params2, ks=KS, dilation=DIL)
    assert out2.shape == (N, OUTC2 * EXPANSION)
    assert np.all(np.isfinite(np.asarray(out2)))
    np.testing.assert_allclose(np.asarray(out2), np.asarray(ref2), rtol=5e-2, atol=5e-2)

    print("KERNEL_OK")
</pallas_src>

<mosaic_0001>
module attributes {stable_mosaic.version = 11 : i64} {
  func.func @kernel(%arg0: i32, %arg1: memref<32x128xf32, #tpu.memory_space<vmem>>, %arg2: memref<128x256xbf16, #tpu.memory_space<vmem>>, %arg3: memref<32x128xbf16, #tpu.memory_space<vmem>>, %arg4: memref<32x128xbf16, #tpu.memory_space<vmem>>, %arg5: memref<1x2x128xf32, #tpu.memory_space<vmem>>, %arg6: memref<1x2x128xf32, #tpu.memory_space<vmem>>) attributes {dimension_semantics = [#tpu.dimension_semantics<parallel>], iteration_bounds = array<i64: 2>, scalar_prefetch = 0 : i64, scratch_operands = 0 : i64, tpu.core_type = #tpu.core_type<tc>, window_params = [{transform_indices = @transform_0, window_bounds = array<i64: 32, 128>}, {pipeline_mode = #tpu.pipeline_mode<synchronous>, transform_indices = @transform_1, window_bounds = array<i64: 128, 256>}, {transform_indices = @transform_2, window_bounds = array<i64: 32, 128>}, {transform_indices = @transform_3, window_bounds = array<i64: 32, 128>}, {transform_indices = @transform_4, window_bounds = array<i64: 1, 2, 128>}, {transform_indices = @transform_5, window_bounds = array<i64: 1, 2, 128>}]} {
    %c0 = arith.constant 0 : index
    %c0_0 = arith.constant 0 : index
    %0 = vector.load %arg1[%c0, %c0_0] : memref<32x128xf32, #tpu.memory_space<vmem>>, vector<32x128xf32>
    %1 = arith.truncf %0 : vector<32x128xf32> to vector<32x128xbf16>
    %c0_1 = arith.constant 0 : index
    %c0_2 = arith.constant 0 : index
    %2 = vector.load %arg2[%c0_1, %c0_2] : memref<128x256xbf16, #tpu.memory_space<vmem>>, vector<128x256xbf16>
    %cst = arith.constant dense<0.000000e+00> : vector<32x256xf32>
    %3 = tpu.matmul %1, %2, %cst {dimension_numbers = #tpu.dot_dimension_numbers<[1], [0], [0], [1], [0, 0, 1, 1], [], []>} : vector<32x128xbf16>, vector<128x256xbf16>, vector<32x256xf32> -> vector<32x256xf32>
    %4 = vector.extract_strided_slice %3 {offsets = [0, 0], sizes = [32, 128], strides = [1, 1]} : vector<32x256xf32> to vector<32x128xf32>
    %5 = vector.extract_strided_slice %3 {offsets = [0, 128], sizes = [32, 128], strides = [1, 1]} : vector<32x256xf32> to vector<32x128xf32>
    %6 = arith.truncf %4 : vector<32x128xf32> to vector<32x128xbf16>
    %c0_3 = arith.constant 0 : index
    %c0_4 = arith.constant 0 : index
    %7 = vector.load %arg3[%c0_3, %c0_4] : memref<32x128xbf16, #tpu.memory_space<vmem>>, vector<32x128xbf16>
    tpu.vector_store %arg3[%c0_3, %c0_4], %6 {strides = array<i32>} : memref<32x128xbf16, #tpu.memory_space<vmem>>, vector<32x128xbf16>,
    %8 = arith.truncf %5 : vector<32x128xf32> to vector<32x128xbf16>
    %c0_5 = arith.constant 0 : index
    %c0_6 = arith.constant 0 : index
    %9 = vector.load %arg4[%c0_5, %c0_6] : memref<32x128xbf16, #tpu.memory_space<vmem>>, vector<32x128xbf16>
    tpu.vector_store %arg4[%c0_5, %c0_6], %8 {strides = array<i32>} : memref<32x128xbf16, #tpu.memory_space<vmem>>, vector<32x128xbf16>,
    %cst_7 = arith.constant dense<0.000000e+00> : vector<128xf32>
    %10 = vector.multi_reduction <add>, %4, %cst_7 [0] : vector<32x128xf32> to vector<128xf32>
    %11 = vector.shape_cast %10 : vector<128xf32> to vector<1x128xf32>
    %12 = arith.mulf %4, %4 : vector<32x128xf32>
    %cst_8 = arith.constant dense<0.000000e+00> : vector<128xf32>
    %13 = vector.multi_reduction <add>, %12, %cst_8 [0] : vector<32x128xf32> to vector<128xf32>
    %14 = vector.shape_cast %13 : vector<128xf32> to vector<1x128xf32>
    %15 = tpu.concatenate %11, %14 in 0 : vector<1x128xf32>, vector<1x128xf32> -> vector<2x128xf32>
    %c0_9 = arith.constant 0 : index
    %c0_10 = arith.constant 0 : index
    %c0_11 = arith.constant 0 : index
    %16 = vector.load %arg5[%c0_9, %c0_10, %c0_11] : memref<1x2x128xf32, #tpu.memory_space<vmem>>, vector<1x2x128xf32>
    %17 = vector.shape_cast %16 : vector<1x2x128xf32> to vector<2x128xf32>
    %18 = vector.shape_cast %15 : vector<2x128xf32> to vector<1x2x128xf32>
    tpu.vector_store %arg5[%c0_9, %c0_10, %c0_11], %18 {strides = array<i32>} : memref<1x2x128xf32, #tpu.memory_space<vmem>>, vector<1x2x128xf32>,
    %cst_12 = arith.constant dense<0.000000e+00> : vector<128xf32>
    %19 = vector.multi_reduction <add>, %5, %cst_12 [0] : vector<32x128xf32> to vector<128xf32>
    %20 = vector.shape_cast %19 : vector<128xf32> to vector<1x128xf32>
    %21 = arith.mulf %5, %5 : vector<32x128xf32>
    %cst_13 = arith.constant dense<0.000000e+00> : vector<128xf32>
    %22 = vector.multi_reduction <add>, %21, %cst_13 [0] : vector<32x128xf32> to vector<128xf32>
    %23 = vector.shape_cast %22 : vector<128xf32> to vector<1x128xf32>
    %24 = tpu.concatenate %20, %23 in 0 : vector<1x128xf32>, vector<1x128xf32> -> vector<2x128xf32>
    %c0_14 = arith.constant 0 : index
    %c0_15 = arith.constant 0 : index
    %c0_16 = arith.constant 0 : index
    %25 = vector.load %arg6[%c0_14, %c0_15, %c0_16] : memref<1x2x128xf32, #tpu.memory_space<vmem>>, vector<1x2x128xf32>
    %26 = vector.shape_cast %25 : vector<1x2x128xf32> to vector<2x128xf32>
    %27 = vector.shape_cast %24 : vector<2x128xf32> to vector<1x2x128xf32>
    tpu.vector_store %arg6[%c0_14, %c0_15, %c0_16], %27 {strides = array<i32>} : memref<1x2x128xf32, #tpu.memory_space<vmem>>, vector<1x2x128xf32>,
    return
  }
  func.func @transform_0(%arg0: i32) -> (i32, i32) {
    %c0_i32 = arith.constant 0 : i32
    %c0_i32_0 = arith.constant 0 : i32
    return %arg0, %c0_i32 : i32, i32
  }
  func.func @transform_1(%arg0: i32) -> (i32, i32) {
    %c0_i32 = arith.constant 0 : i32
    %c0_i32_0 = arith.constant 0 : i32
    %c0_i32_1 = arith.constant 0 : i32
    return %c0_i32, %c0_i32_0 : i32, i32
  }
  func.func @transform_2(%arg0: i32) -> (i32, i32) {
    %c0_i32 = arith.constant 0 : i32
    %c0_i32_0 = arith.constant 0 : i32
    return %arg0, %c0_i32 : i32, i32
  }
  func.func @transform_3(%arg0: i32) -> (i32, i32) {
    %c0_i32 = arith.constant 0 : i32
    %c0_i32_0 = arith.constant 0 : i32
    return %arg0, %c0_i32 : i32, i32
  }
  func.func @transform_4(%arg0: i32) -> (i32, i32, i32) {
    %c0_i32 = arith.constant 0 : i32
    %c0_i32_0 = arith.constant 0 : i32
    %c0_i32_1 = arith.constant 0 : i32
    return %arg0, %c0_i32, %c0_i32_0 : i32, i32, i32
  }
  func.func @transform_5(%arg0: i32) -> (i32, i32, i32) {
    %c0_i32 = arith.constant 0 : i32
    %c0_i32_0 = arith.constant 0 : i32
    %c0_i32_1 = arith.constant 0 : i32
    return %arg0, %c0_i32, %c0_i32_0 : i32, i32, i32
  }
}

</mosaic_0001>

<bundles_post_ra>
// kernel: tpu_custom_call.1
= control target key start
LH: loop header
LB: loop body
LE: loop exit
PB: predicated region body
PF: predicated region fallthrough
CT: control target
= control target key end

     0   :  { %11 = vsyncpa [#allocation3], 0  ;;  %s1540_s0 = inlined_call_operand.hbm [shape: f32[64,128], index: 0, kind: input, shape index: {}]   ;;  %s1541_s1 = inlined_call_operand.hbm [shape: bf16[128,256], index: 1, kind: input, shape index: {}]   ;;  %s1542_s2 = inlined_call_operand.hbm [shape: bf16[64,128], index: 2, kind: output, shape index: {0}]   ;;  %s1543_s3 = inlined_call_operand.hbm [shape: bf16[64,128], index: 3, kind: output, shape index: {1}]   ;;  %s1544_s4 = inlined_call_operand.hbm [shape: f32[2,2,128], index: 4, kind: output, shape index: {2}]   ;;  %s1545_s5 = inlined_call_operand.hbm [shape: f32[2,2,128], index: 5, kind: output, shape index: {3}]  }
   0x1   :  { %13 = vsyncpa [#allocation3 + $0x1], 0 }
   0x2   :  { %14 = vsyncpa [#allocation6], 0 }
   0x3   :  { %15 = vsyncpa [#allocation4], 0 }
   0x4   :  { %17 = vsyncpa [#allocation4 + $0x1], 0 }
   0x5   :  { %18 = vsyncpa [#allocation9], 0 }
   0x6   :  { %20 = vsyncpa [#allocation9 + $0x1], 0 }
   0x7   :  { %21 = vsyncpa [#allocation12], 0 }
   0x8   :  { %23 = vsyncpa [#allocation12 + $0x1], 0  ;;  %s1232_s18 = smov 0   ;;  %s1234_s19 = smov 0  }
   0x9   :  { %s1236_s20 = smov 0   ;;  %s1238_s21 = smov 0  }
   0xa LB: > { %s1253_s22 = sadd.s32 4294967295, %s1189_s21   ;;  %s1547_s23 = sadd.s32 4294967294, %s1189_s21   ;;  %s1189_s21 = sphi %s1238_s21, %s1572_s21   ;;  %s1185_s20 = sphi %s1236_s20, %s1571_s20   ;;  %s1181_s19 = sphi %s1234_s19, %s1570_s19   ;;  %s1177_s18 = sphi %s1232_s18, %s1569_s18  }
   0xb   : > { %p49_p0 = scmp.ne.s32.totalorder %s1181_s19, %s1177_s18  ;;  %p1546_p1 = scmp.eq.s32.totalorder %s1253_s22, 0 }
   0xc   : > { %p100_p3 = scmp.eq.s32.totalorder %s1547_s23, 1  ;;  %p782_p5 = scmp.ge.s32.totalorder %s1189_s21, 1 }
   0xd   : > { %p1264_p4 = por %p1546_p1, %p49_p0  ;;  %p185_p7 = scmp.lt.s32.totalorder %s1189_s21, 3 }
   0xe   : > { %p1269_p6 = por %p100_p3, %p49_p0  ;;  %s1191_s27 = smov [#allocation5]  }
   0xf   : > { %s1552_s24 = scalar_select %p1264_p4, 1, 0 }
  0x10   : > { %s1553_s25 = scalar_select %p1269_p6, 1, 0 }
  0x11   : > { %p1274_p8 = pnand %p782_p5, %p185_p7  ;;  %s197_s28 = sshll.u32 %s1191_s27, 4  ;;  %s198_s28 = int_to_ptr.vmem [resolvable:$true] %s197_s28 }
  0x12   : > { %s1288_s30 = sadd.s32 1, %s1189_s21   ;;  %s36_s6 = sadd.s32 1, %s1185_s20 }
  0x13   : > { %s1554_s26 = scalar_select %p1274_p8, 1, 0 }
  0x14   : > { %p894_p9 = pneg %p1274_p8  ;;  %s33_s7 = ssub.s32 %s1189_s21, %s1288_s30 }
  0x15   : > { %s992_s8 = scalar_lea.vmem %s198_s28, 2048  ;;  %p1000_p5 = scmp.lt.s32.totalorder %s198_s28, %s198_s28 }
  0x16   : > { %p1283_p11 = pnand %p894_p9, %p1546_p1  ;;  %p993_p13 = scmp.ne.s32.totalorder %s198_s28, %s992_s8 }
  0x17   : > { %p1001_p7 = scmp.lt.s32.totalorder %s992_s8, %s992_s8 }
  0x18   : > { %p983_p12 = pneg %p1283_p11 }
  0x19   : > { %p1002_p10 = por %p1001_p7, %p1000_p5 }
  0x1a   : > { %p995_p0 = pnand %p993_p13, %p983_p12 }
  0x1c   : > { %p996_p3 = pneg %p995_p0 }
  0x1e   : > { %p1003_p2 = pnand %p1002_p10, %p996_p3 }
  0x20   : > { %1006 = shalt.err (!%p1003_p2)
}
  0x21   : > { %s1548_s9 = smov 128   ;;  %s1193_s10 = smov 8  }
  0x22   : > { %897 = dma.hbm_to_vmem [thread:$0]  (!%p1283_p11), %s1541_s1, 2048, %s198_s28, [#allocation6], %s1548_s9, %s1548_s9, %s1193_s10  }
  0x23   : > { %p34_p2 = scmp.eq.s32.totalorder %s33_s7, 0  ;;  %p43_p9 = scmp.ne.s32.totalorder %s1185_s20, %s1181_s19 }
  0x24   : > { %p44_p10 = scmp.eq.s32.totalorder %s1189_s21, 0  ;;  %p916_p12 = scmp.lt.s32.totalorder %s1189_s21, 2 }
  0x25   : > { %s1308_s13 = scalar_select %p34_p2, %s1185_s20, %s36_s6  }
  0x26   : > { %p45_p13 = por %p44_p10, %p43_p9  ;;  %p1556_p0 = scmp.eq.s32.totalorder %s1253_s22, 1 }
  0x27   : > { %s211_s15 = sand.u32 1, %s1185_s20   ;;  %s831_s16 = sshll.u32 %s1189_s21, 9 }
  0x28   : > { %p1312_p3 = por %p1556_p0, %p43_p9  ;;  %s785_s17 = sshll.u32 %s211_s15, 5 }
  0x29   : > { %s1321_s8 = scalar_lea.hbm %s1540_s0, %s831_s16  ;;  %s215_s28 = scalar_lea.vmem [#allocation2], %s785_s17 }
  0x2a   : > { %s1557_s14 = scalar_select %p1312_p3, 1, 0 }
  0x2b   : > { %s222_s6 = sshll.u32 %s215_s28, 4  ;;  %p1323_p11 = pnand %p916_p12, %p45_p13  ;;  %s1327_s6 = int_to_ptr.vmem [resolvable:$true] %s222_s6 }
  0x2c   : > { %s1329_s11 = scalar_lea.sflag [#allocation3], %s211_s15  ;;  %s1007_s12 = scalar_lea.hbm %s1321_s8, 512 }
  0x2d   : > { %p1008_p5 = scmp.ne.s32.totalorder %s1321_s8, %s1007_s12  ;;  %p1009_p7 = pneg %p1323_p11 }
  0x2e   : > { %s1012_s17 = scalar_lea.hbm %s1540_s0, 1024  ;;  %p1013_p10 = scmp.lt.s32.totalorder %s1321_s8, %s1540_s0 }
  0x2f   : > { %p1010_p2 = pnand %p1009_p7, %p1008_p5  ;;  %p1014_p12 = scmp.lt.s32.totalorder %s1012_s17, %s1007_s12 }
  0x31   : > { %p1011_p9 = pneg %p1010_p2  ;;  %p1015_p13 = por %p1014_p12, %p1013_p10 }
  0x33   : > { %p1016_p0 = pnand %p1015_p13, %p1011_p9 }
  0x35   : > { %1019 = shalt.err (!%p1016_p0)
}
  0x36   : > { %s1020_s15 = scalar_lea.vmem %s1327_s6, 512  ;;  %s1194_s23 = smov [#allocation2]  }
  0x37   : > { %p1021_p1 = scmp.ne.s32.totalorder %s1327_s6, %s1020_s15  ;;  %s1025_s9 = sshll.u32 %s1194_s23, 4  ;;  %s1026_s9 = int_to_ptr.vmem [resolvable:$false] %s1025_s9 }
  0x38   : > { %s1027_s16 = scalar_lea.vmem %s1026_s9, 1024  ;;  %p1028_p2 = scmp.lt.s32.totalorder %s1327_s6, %s1026_s9 }
  0x39   : > { %p1023_p6 = pnand %p1021_p1, %p1009_p7  ;;  %p1029_p3 = scmp.lt.s32.totalorder %s1027_s16, %s1020_s15 }
  0x3b   : > { %p1024_p5 = pneg %p1023_p6  ;;  %p1030_p4 = por %p1029_p3, %p1028_p2 }
  0x3d   : > { %p1031_p8 = pnand %p1030_p4, %p1024_p5 }
  0x3f   : > { %1034 = shalt.err (!%p1031_p8)
}
  0x40   : > { %s1559_s12 = smov 128   ;;  %p1560_p1 = scmp.ne.s32.totalorder %s1554_s26, 0 }
  0x41   : > { %901 = dma.hbm_to_vmem [thread:$0]  (!%p1323_p11), %s1321_s8, 512, %s1327_s6, %s1329_s11, %s1559_s12, %s1559_s12, %s1193_s10  }
  0x42   : > { %234 = sbr.rel (%p1560_p1) target bundleno = 400 (0x190), region = 28  ;;  %s1356_s23 = sand.u32 (!%p1560_p1), 1, %s1181_s19  }
  0x43   : > { %s789_s9 = sshll.u32 (!%p1560_p1), %s1356_s23, 5  ;;  %s237_s27 = scalar_lea.sflag (!%p1560_p1), [#allocation3], %s1356_s23 }
  0x44   : > { %s1360_s17 = scalar_lea.vmem (!%p1560_p1), [#allocation2], %s789_s9  ;;  %p1561_p4 = scmp.ne.s32.totalorder (!%p1560_p1), %s1552_s24, 0 }
  0x47   : > { %1156 = dma.done.wait (%p1561_p4), %s237_s27, 512  }
  0x48   : > { %1158 = vsyncadd (%p1561_p4), %s237_s27, 4294966784  ;;  %p1562_p6 = scmp.eq.s32.totalorder %s1253_s22, 0 }
  0x4a   : > { %1160 = dma.done.wait (%p1562_p6), [#allocation6], 2048   ;;  %p1563_p8 = pmov %p1562_p6 }
  0x4b   : > { %v1195_v0 = vmov 0   ;;  %v957_v1 = vld [vmem:[#allocation5 + $0x74] ss:$8 sps:$4 sm:$0xff]   ;;  %v959_v2 = vld [vmem:[#allocation5 + $0x70] ss:$8 sps:$4 sm:$0xff]   ;;  %v290_v17 = vld [vmem:[%s1360_s17] sm:$0xff] }
  0x4c   : > { %1162 = vsyncadd (%p1563_p8), [#allocation6], 4294965248  ;;  %424 = vmatprep.mubr.bf16.mxu0 %v1195_v0  ;;  %434 = vmatprep.mubr.bf16.mxu1 %v1195_v0  ;;  %v960_v3 = vld [vmem:[#allocation5 + $0x64] ss:$8 sps:$4 sm:$0xff]   ;;  %v962_v4 = vld [vmem:[#allocation5 + $0x60] ss:$8 sps:$4 sm:$0xff]  }
  0x4d   : > { %392 = vmatprep.subr.bf16.mxu0 %v957_v1  ;;  %864 = vmatprep.subr.bf16.mxu1 %v957_v1  ;;  %v963_v5 = vld [vmem:[#allocation5 + $0x54] ss:$8 sps:$4 sm:$0xff]   ;;  %v965_v6 = vld [vmem:[#allocation5 + $0x50] ss:$8 sps:$4 sm:$0xff]   ;;  %v966_v7 = vld [vmem:[#allocation5 + $0x44] ss:$8 sps:$4 sm:$0xff]  }
  0x4e   : > { %393 = vmatpush1.bf16.msra.mxu0 %v959_v2  ;;  %872 = vmatpush1.bf16.msra.mxu1 %v959_v2  ;;  %v968_v8 = vld [vmem:[#allocation5 + $0x40] ss:$8 sps:$4 sm:$0xff]   ;;  %v969_v9 = vld [vmem:[#allocation5 + $0x34] ss:$8 sps:$4 sm:$0xff]   ;;  %v971_v10 = vld [vmem:[#allocation5 + $0x30] ss:$8 sps:$4 sm:$0xff]  }
  0x4f   : > { %394 = vmatprep.subr.bf16.mxu0 %v960_v3  ;;  %865 = vmatprep.subr.bf16.mxu1 %v960_v3  ;;  %v972_v11 = vld [vmem:[#allocation5 + $0x24] ss:$8 sps:$4 sm:$0xff]   ;;  %v974_v12 = vld [vmem:[#allocation5 + $0x20] ss:$8 sps:$4 sm:$0xff]   ;;  %v975_v13 = vld [vmem:[#allocation5 + $0x14] ss:$8 sps:$4 sm:$0xff]  }
  0x50   : > { %v977_v14 = vld [vmem:[#allocation5 + $0x10] ss:$8 sps:$4 sm:$0xff]   ;;  %v978_v15 = vld [vmem:[#allocation5 + $0x4] ss:$8 sps:$4 sm:$0xff]   ;;  %v980_v16 = vld [vmem:[#allocation5] ss:$8 sps:$4 sm:$0xff]  }
  0x51   : > { %v291_v18 = vld [vmem:[%s1360_s17 + $0x8] sm:$0xff]  ;;  %v292_v19 = vld [vmem:[%s1360_s17 + $0x10] sm:$0xff]  ;;  %v293_v20 = vld [vmem:[%s1360_s17 + $0x18] sm:$0xff]  ;;  %s791_s24 = sshll.u32 %s1356_s23, 4  ;;  %s840_s8 = sshll.u32 %s1253_s22, 8 }
  0x52   : > { %395 = vmatpush1.bf16.msra.mxu0 %v962_v4  ;;  %873 = vmatpush1.bf16.msra.mxu1 %v962_v4  ;;  %v294_v21 = vpack.c.bf16 %v291_v18, %v290_v17  ;;  %v295_v22 = vpack.c.bf16 %v293_v20, %v292_v19  ;;  %s264_s26 = scalar_lea.vmem [#allocation7], %s791_s24  ;;  %s1378_s6 = scalar_lea.vmem [#allocation8], %s791_s24 }
  0x53   : > { %396 = vmatprep.subr.bf16.mxu0 %v963_v5  ;;  %866 = vmatprep.subr.bf16.mxu1 %v963_v5  ;;  %s563_s10 = sshll.u32 %s264_s26, 4  ;;  %s579_s7 = sshll.u32 %s1378_s6, 4  ;;  %s1375_s10 = int_to_ptr.vmem [resolvable:$true] %s563_s10  ;;  %s1387_s7 = int_to_ptr.vmem [resolvable:$true] %s579_s7 }
  0x54   : > { %s1385_s15 = scalar_lea.hbm %s1542_s2, %s840_s8  ;;  %s1394_s9 = scalar_lea.hbm %s1543_s3, %s840_s8 }
  0x55   : > { %s535_s27 = scalar_lea.sflag [#allocation4], %s1356_s23  ;;  %s1035_s17 = scalar_lea.vmem %s1375_s10, 256 }
  0x56   : > { %397 = vmatpush1.bf16.msra.mxu0 %v965_v6  ;;  %874 = vmatpush1.bf16.msra.mxu1 %v965_v6  ;;  %p1036_p3 = scmp.ne.s32.totalorder %s1375_s10, %s1035_s17  ;;  %p1564_p11 = scmp.ne.s32.totalorder %s1557_s14, 0 }
  0x57   : > { %398 = vmatprep.subr.bf16.mxu0 %v966_v7  ;;  %867 = vmatprep.subr.bf16.mxu1 %v966_v7  ;;  %s1196_s24 = smov [#allocation7]  }
  0x58   : > { %p1037_p7 = pnand %p1036_p3, %p1564_p11 }
  0x5a   : > { %399 = vmatpush1.bf16.msra.mxu0 %v968_v8  ;;  %875 = vmatpush1.bf16.msra.mxu1 %v968_v8  ;;  %p1038_p9 = pneg %p1037_p7 }
  0x5b   : > { %400 = vmatprep.subr.bf16.mxu0 %v969_v9  ;;  %868 = vmatprep.subr.bf16.mxu1 %v969_v9 }
  0x5e   : > { %401 = vmatpush1.bf16.msra.mxu0 %v971_v10  ;;  %876 = vmatpush1.bf16.msra.mxu1 %v971_v10 }
  0x5f   : > { %402 = vmatprep.subr.bf16.mxu0 %v972_v11  ;;  %869 = vmatprep.subr.bf16.mxu1 %v972_v11 }
  0x62   : > { %403 = vmatpush1.bf16.msra.mxu0 %v974_v12  ;;  %877 = vmatpush1.bf16.msra.mxu1 %v974_v12 }
  0x63   : > { %404 = vmatprep.subr.bf16.mxu0 %v975_v13  ;;  %870 = vmatprep.subr.bf16.mxu1 %v975_v13 }
  0x66   : > { %405 = vmatpush1.bf16.msra.mxu0 %v977_v14  ;;  %878 = vmatpush1.bf16.msra.mxu1 %v977_v14 }
  0x67   : > { %406 = vmatprep.subr.bf16.mxu0 %v978_v15  ;;  %871 = vmatprep.subr.bf16.mxu1 %v978_v15 }
  0x6a   : > { %407 = vmatpush1.bf16.msra.mxu0 %v980_v16  ;;  %879 = vmatpush1.bf16.msra.mxu1 %v980_v16 }
  0x6d   : > { %425 = vmatmul.mubr.bf16.vlgmr.msra.gmra.mxu0 %v294_v21  ;;  %435 = vmatmul.mubr.bf16.vlgmr.msra.gmra.mxu1 %v295_v22 }
 0x12d   : > { %v426_v23 = vpop.f32.mrf.mxu0  ;;  %v436_v24 = vpop.f32.mrf.mxu1 }
 0x12e   : > { %v494_v27 = vmul.f32 %v426_v23, %v426_v23  ;;  %v496_v34 = vmul.f32 %v436_v24, %v436_v24 }
 0x12f   : > { %v428_v25 = vpop.f32.mrf.mxu0  ;;  %v438_v26 = vpop.f32.mrf.mxu1 }
 0x130   : > { %v519_v41 = vmul.f32 %v428_v25, %v428_v25 }
 0x131   : > { %v430_v28 = vpop.f32.mrf.mxu0  ;;  %v440_v29 = vpop.f32.mrf.mxu1 }
 0x132   : > { %v845_v30 = vpack.c.bf16 %v430_v28, %v426_v23  ;;  %v485_v31 = vadd.f32 %v430_v28, %v426_v23  ;;  %v495_v32 = vmul.f32 %v430_v28, %v430_v28  ;;  %v850_v33 = vpack.c.bf16 %v440_v29, %v436_v24 }
 0x133   : > { %v432_v35 = vpop.f32.mrf.mxu0  ;;  %v1389_v36 = vpop.f32.mrf.mxu1 }
 0x134   : > { %846 = vst [vmem:[%s264_s26] sm:$0xff] %v845_v30   ;;  %v498_v37 = vadd.f32 %v495_v32, %v494_v27  ;;  %862 = vst [vmem:[%s264_s26 + $0x8] sm:$0xff] %v850_v33   ;;  %v486_v38 = vadd.f32 %v485_v31, %v436_v24  ;;  %v855_v39 = vpack.c.bf16 %v432_v35, %v428_v25  ;;  %s1039_s26 = sshll.u32 %s1196_s24, 4  ;;  %s1040_s26 = int_to_ptr.vmem [resolvable:$false] %s1039_s26 }
 0x135   : > { %v510_v40 = vadd.f32 %v432_v35, %v428_v25  ;;  %v520_v42 = vmul.f32 %v432_v35, %v432_v35  ;;  %v860_v43 = vpack.c.bf16 %v1389_v36, %v438_v26  ;;  %s1041_s29 = scalar_lea.vmem %s1040_s26, 512  ;;  %p1042_p10 = scmp.lt.s32.totalorder %s1375_s10, %s1040_s26 }
 0x136   : > { %p1043_p12 = scmp.lt.s32.totalorder %s1041_s29, %s1035_s17 }
 0x138   : > { %p1044_p13 = por %p1043_p12, %p1042_p10 }
 0x13a   : > { %p1045_p0 = pnand %p1044_p13, %p1038_p9 }
 0x13c   : > { %1048 = shalt.err (!%p1045_p0)
}
 0x13d   : > { %s1049_s8 = scalar_lea.hbm %s1385_s15, 256  ;;  %s1053_s12 = scalar_lea.hbm %s1542_s2, 512 }
 0x13e   : > { %p1050_p5 = scmp.ne.s32.totalorder %s1385_s15, %s1049_s8  ;;  %p1054_p4 = scmp.lt.s32.totalorder %s1385_s15, %s1542_s2 }
 0x13f   : > { %p1055_p6 = scmp.lt.s32.totalorder %s1053_s12, %s1049_s8 }
 0x140   : > { %p1051_p2 = pnand %p1050_p5, %p1564_p11 }
 0x141   : > { %p1056_p8 = por %p1055_p6, %p1054_p4 }
 0x142   : > { %p1052_p1 = pneg %p1051_p2 }
 0x144   : > { %p1057_p3 = pnand %p1056_p8, %p1052_p1 }
 0x146   : > { %1060 = shalt.err (!%p1057_p3)
}
 0x147   : > { %s1197_s17 = smov 64   ;;  %s1198_s26 = smov 4   ;;  %v487_v44 = vadd.f32 %v486_v38, %v440_v29  ;;  %v497_v45 = vmul.f32 %v440_v29, %v440_v29  ;;  %v499_v46 = vadd.f32 %v498_v37, %v496_v34  ;;  %856 = vst [vmem:[%s1378_s6] sm:$0xff] %v855_v39   ;;  %v511_v47 = vadd.f32 %v510_v40, %v438_v26 }
 0x148   : > { %886 = dma.vmem_to_hbm [thread:$0]  (%p1564_p11), %s1375_s10, 256, %s1385_s15, %s535_s27, %s1197_s17, %s1197_s17, %s1198_s26   ;;  %v521_v48 = vmul.f32 %v438_v26, %v438_v26  ;;  %v523_v49 = vadd.f32 %v520_v42, %v519_v41 }
 0x149   : > { %863 = vst [vmem:[%s1378_s6 + $0x8] sm:$0xff] %v860_v43   ;;  %v488_v50 = vrot.slane %v487_v44, 4  ;;  %v500_v51 = vadd.f32 %v499_v46, %v497_v45  ;;  %v512_v52 = vadd.f32 %v511_v47, %v1389_v36  ;;  %s1565_s11 = sand.u32 1, %s1253_s22   ;;  %s1061_s8 = scalar_lea.vmem %s1387_s7, 256 }
 0x14a   : > { %s1428_s29 = scalar_lea.sflag [#allocation9], %s1565_s11  ;;  %p1062_p7 = scmp.ne.s32.totalorder %s1387_s7, %s1061_s8 }
 0x14b   : > { %s1199_s10 = smov [#allocation8]  }
 0x14c   : > { %p1063_p9 = pnand %p1062_p7, %p1564_p11  ;;  %s1065_s15 = sshll.u32 %s1199_s10, 4  ;;  %s1066_s15 = int_to_ptr.vmem [resolvable:$false] %s1065_s15 }
 0x14d   : > { %s1067_s27 = scalar_lea.vmem %s1066_s15, 512  ;;  %p1068_p12 = scmp.lt.s32.totalorder %s1387_s7, %s1066_s15 }
 0x14e   : > { %p1064_p10 = pneg %p1063_p9  ;;  %p1069_p13 = scmp.lt.s32.totalorder %s1067_s27, %s1061_s8 }
 0x150   : > { %p1070_p0 = por %p1069_p13, %p1068_p12 }
 0x152   : > { %p1071_p5 = pnand %p1070_p0, %p1064_p10 }
 0x154   : > { %1074 = shalt.err (!%p1071_p5)
}
 0x155   : > { %s1075_s6 = scalar_lea.hbm %s1394_s9, 256  ;;  %s1079_s12 = scalar_lea.hbm %s1543_s3, 512 }
 0x156   : > { %p1076_p2 = scmp.ne.s32.totalorder %s1394_s9, %s1075_s6  ;;  %p1080_p6 = scmp.lt.s32.totalorder %s1394_s9, %s1543_s3 }
 0x157   : > { %p1081_p8 = scmp.lt.s32.totalorder %s1079_s12, %s1075_s6 }
 0x158   : > { %p1077_p1 = pnand %p1076_p2, %p1564_p11 }
 0x159   : > { %p1082_p3 = por %p1081_p8, %p1080_p6 }
 0x15a   : > { %p1078_p4 = pneg %p1077_p1 }
 0x15c   : > { %p1083_p7 = pnand %p1082_p3, %p1078_p4 }
 0x15e   : > { %1086 = shalt.err (!%p1083_p7)
}
 0x15f   : > { %887 = dma.vmem_to_hbm [thread:$0]  (%p1564_p11), %s1387_s7, 256, %s1394_s9, %s1428_s29, %s1197_s17, %s1197_s17, %s1198_s26   ;;  %v522_v53 = vmul.f32 %v1389_v36, %v1389_v36  ;;  %v524_v54 = vadd.f32 %v523_v49, %v521_v48  ;;  %v489_v55 = vadd.f32 %v488_v50, %v487_v44  ;;  %v501_v56 = vrot.slane %v500_v51, 4 }
 0x160   : > { %v513_v57 = vrot.slane %v512_v52, 4  ;;  %s793_s8 = sshll.u32 %s1356_s23, 1  ;;  %s827_s7 = sshll.u32 %s1253_s22, 5  ;;  %vm507_vm0 = vcmask 1040384  }
 0x161   : > { %v525_v58 = vadd.f32 %v524_v54, %v522_v53  ;;  %v490_v59 = vrot.slane %v489_v55, 2  ;;  %v502_v60 = vadd.f32 %v501_v56, %v500_v51  ;;  %s278_s9 = scalar_lea.vmem [#allocation10], %s793_s8  ;;  %s1458_s26 = scalar_lea.vmem [#allocation11], %s793_s8 }
 0x162   : > { %v514_v61 = vadd.f32 %v513_v57, %v512_v52  ;;  %s595_s17 = sshll.u32 %s278_s9, 4  ;;  %s608_s10 = sshll.u32 %s1458_s26, 4  ;;  %s1466_s17 = int_to_ptr.vmem [resolvable:$true] %s595_s17  ;;  %s1474_s10 = int_to_ptr.vmem [resolvable:$true] %s608_s10 }
 0x163   : > { %v526_v62 = vrot.slane %v525_v58, 4  ;;  %v491_v63 = vadd.f32 %v490_v59, %v489_v55  ;;  %v503_v0 = vrot.slane %v502_v60, 2  ;;  %s1464_s6 = scalar_lea.hbm %s1544_s4, %s827_s7  ;;  %s1472_s16 = scalar_lea.hbm %s1545_s5, %s827_s7 }
 0x164   : > { %v515_v1 = vrot.slane %v514_v61, 2  ;;  %s1087_s12 = scalar_lea.vmem %s1466_s17, 32  ;;  %s1200_s24 = smov [#allocation10]  }
 0x165   : > { %v527_v2 = vadd.f32 %v526_v62, %v525_v58  ;;  %v492_v3 = vrot.slane %v491_v63, 1  ;;  %v504_v4 = vadd.f32 %v503_v0, %v502_v60  ;;  %p1088_p9 = scmp.ne.s32.totalorder %s1466_s17, %s1087_s12  ;;  %s1091_s11 = sshll.u32 %s1200_s24, 4  ;;  %s1092_s11 = int_to_ptr.vmem [resolvable:$false] %s1091_s11 }
 0x166   : > { %v516_v5 = vadd.f32 %v515_v1, %v514_v61  ;;  %s1093_s8 = scalar_lea.vmem %s1092_s11, 64  ;;  %p1094_p13 = scmp.lt.s32.totalorder %s1466_s17, %s1092_s11 }
 0x167   : > { %v528_v6 = vrot.slane %v527_v2, 2  ;;  %v505_v7 = vrot.slane %v504_v4, 1  ;;  %v493_v10 = vadd.f32 %v492_v3, %v491_v63  ;;  %p1089_p10 = pnand %p1088_p9, %p1564_p11  ;;  %p1095_p0 = scmp.lt.s32.totalorder %s1093_s8, %s1087_s12 }
 0x168   : > { %v517_v8 = vrot.slane %v516_v5, 1 }
 0x169   : > { %v529_v9 = vadd.f32 %v528_v6, %v527_v2  ;;  %v506_v11 = vadd.f32 %v505_v7, %v504_v4  ;;  %p1090_p12 = pneg %p1089_p10  ;;  %p1096_p5 = por %p1095_p0, %p1094_p13 }
 0x16a   : > { %v518_v14 = vadd.f32 %v517_v8, %v516_v5 }
 0x16b   : > { %v530_v12 = vrot.slane %v529_v9, 1  ;;  %v508_v13 = vsel %vm507_vm0, %v493_v10, %v506_v11  ;;  %p1097_p2 = pnand %p1096_p5, %p1090_p12 }
 0x16c   : > { %509 = vst [vmem:[%s278_s9] sm:$0x3] %v508_v13 }
 0x16d   : > { %v531_v15 = vadd.f32 %v530_v12, %v529_v9 }
 0x16e   : > { %1100 = shalt.err (!%p1097_p2)
}
 0x16f   : > { %s1101_s7 = scalar_lea.hbm %s1464_s6, 32  ;;  %s1105_s27 = scalar_lea.hbm %s1544_s4, 64 }
 0x170   : > { %p1102_p1 = scmp.ne.s32.totalorder %s1464_s6, %s1101_s7  ;;  %p1106_p8 = scmp.lt.s32.totalorder %s1464_s6, %s1544_s4 }
 0x171   : > { %p1107_p3 = scmp.lt.s32.totalorder %s1105_s27, %s1101_s7 }
 0x172   : > { %p1103_p4 = pnand %p1102_p1, %p1564_p11 }
 0x173   : > { %p1108_p7 = por %p1107_p3, %p1106_p8 }
 0x174   : > { %p1104_p6 = pneg %p1103_p4 }
 0x176   : > { %p1109_p9 = pnand %p1108_p7, %p1104_p6 }
 0x178   : > { %1112 = shalt.err (!%p1109_p9)
}
 0x179   : > { %888 = dma.vmem_to_hbm [thread:$0]  (%p1564_p11), %s1466_s17, 32, %s1464_s6, %s1428_s29   ;;  %v532_v16 = vsel %vm507_vm0, %v518_v14, %v531_v15 }
 0x17a   : > { %533 = vst [vmem:[%s1458_s26] sm:$0x3] %v532_v16  ;;  %s550_s12 = scalar_lea.sflag [#allocation12], %s1356_s23  ;;  %s1113_s24 = scalar_lea.vmem %s1474_s10, 32 }
 0x17b   : > { %p1114_p10 = scmp.ne.s32.totalorder %s1474_s10, %s1113_s24  ;;  %s1201_s11 = smov [#allocation11]  }
 0x17c   : > { %s1117_s8 = sshll.u32 %s1201_s11, 4  ;;  %s1118_s8 = int_to_ptr.vmem [resolvable:$false] %s1117_s8 }
 0x17d   : > { %p1115_p12 = pnand %p1114_p10, %p1564_p11  ;;  %s1119_s7 = scalar_lea.vmem %s1118_s8, 64 }
 0x17e   : > { %p1120_p0 = scmp.lt.s32.totalorder %s1474_s10, %s1118_s8  ;;  %p1121_p5 = scmp.lt.s32.totalorder %s1119_s7, %s1113_s24 }
 0x17f   : > { %p1116_p13 = pneg %p1115_p12 }
 0x180   : > { %p1122_p2 = por %p1121_p5, %p1120_p0 }
 0x182   : > { %p1123_p1 = pnand %p1122_p2, %p1116_p13 }
 0x184   : > { %1126 = shalt.err (!%p1123_p1)
}
 0x185   : > { %s1127_s29 = scalar_lea.hbm %s1472_s16, 32  ;;  %s1131_s26 = scalar_lea.hbm %s1545_s5, 64 }
 0x186   : > { %p1128_p4 = scmp.ne.s32.totalorder %s1472_s16, %s1127_s29  ;;  %p1132_p3 = scmp.lt.s32.totalorder %s1472_s16, %s1545_s5 }
 0x187   : > { %p1133_p7 = scmp.lt.s32.totalorder %s1131_s26, %s1127_s29 }
 0x188   : > { %p1129_p6 = pnand %p1128_p4, %p1564_p11 }
 0x189   : > { %p1134_p9 = por %p1133_p7, %p1132_p3 }
 0x18a   : > { %p1130_p8 = pneg %p1129_p6 }
 0x18c   : > { %p1135_p10 = pnand %p1134_p9, %p1130_p8 }
 0x18e   : > { %1138 = shalt.err (!%p1135_p10)
}
 0x18f   : > { %889 = dma.vmem_to_hbm [thread:$0]  (%p1564_p11), %s1474_s10, 32, %s1472_s16, %s550_s12  }
 0x190 PF: > { %s620_s15 = sand.u32 1, %s1177_s18   ;;  %p1566_p12 = scmp.ne.s32.totalorder %s1553_s25, 0 }
 0x191   : > { %p1567_p13 = scmp.ge.s32.totalorder %s1189_s21, 2  ;;  %s621_s27 = scalar_lea.sflag [#allocation4], %s620_s15 }
 0x193   : > { %p903_p0 = pnand %p1567_p13, %p1566_p12 }
 0x195   : > { %p904_p5 = pneg %p903_p0 }
 0x197   : > { %1164 = dma.done.wait (%p904_p5), %s621_s27, 256  }
 0x198   : > { %1166 = vsyncadd (%p904_p5), %s621_s27, 4294967040  ;;  %s1568_s22 = sadd.s32 4294967294, %s1189_s21  }
 0x199   : > { %s629_s28 = sand.u32 1, %s1568_s22  }
 0x19a   : > { %s630_s24 = scalar_lea.sflag [#allocation9], %s629_s28 }
 0x19b   : > { %1168 = dma.done.wait (%p904_p5), %s630_s24, 288  }
 0x19c   : > { %1170 = vsyncadd (%p904_p5), %s630_s24, 4294967008  ;;  %s648_s14 = scalar_lea.sflag [#allocation12], %s620_s15 }
 0x19d   : > { %1172 = dma.done.wait (%p904_p5), %s648_s14, 32  }
 0x19e   : > { %1174 = vsyncadd (%p904_p5), %s648_s14, 4294967264  ;;  %p26_p11 = scmp.ge.s32.totalorder %s1288_s30, 4   ;;  %s1569_s18 = smov %s1181_s19 }
 0x19f   : > { %s1570_s19 = smov %s1185_s20  ;;  %s1571_s20 = smov %s1308_s13 }
 0x1a0   : > { %s1572_s21 = smov %s1288_s30  ;;  %28 = sbr.rel (!%p26_p11) target bundleno = 10 (0xa), region = 126 }
 0x1a5   :  { %653 = vsyncpa [#allocation3], 1 }
 0x1a6   :  { %655 = vsyncpa [#allocation3 + $0x1], 1 }
 0x1a7   :  { %656 = vsyncpa [#allocation6], 1 }
 0x1a8   :  { %657 = vsyncpa [#allocation4], 1 }
 0x1a9   :  { %659 = vsyncpa [#allocation4 + $0x1], 1 }
 0x1aa   :  { %660 = vsyncpa [#allocation9], 1 }
 0x1ab   :  { %662 = vsyncpa [#allocation9 + $0x1], 1 }
 0x1ac   :  { %663 = vsyncpa [#allocation12], 1 }
 0x1ad   :  { %665 = vsyncpa [#allocation12 + $0x1], 1 }

</bundles_post_ra>
